<compile_context>
chip_gen: v7x
topology: tpu7x:2x2x1
jax: 0.10.0
libtpu: 0.0.40
codegen_flags: <defaults>
</compile_context>

<pallas_src>
import functools
import math

import jax
import jax.numpy as jnp
from jax.experimental import pallas as pl
from jax.experimental.pallas import tpu as pltpu


_LANE = 128                             # TPU lane width
_SUBLANE = 8                            # f32 sublane count
_MAX_TM = 8192                          # cap on packed-row tile
_WEIGHT_VMEM_BUDGET = 8 * 1024 * 1024   # cap on replicated weights incl. buffering copies
_VMEM_HEADROOM = 2 * 1024 * 1024        # slack for Mosaic-internal scratch


def _cdiv(a, b):
    return -(-a // b)


def _round_up(a, b):
    return _cdiv(a, b) * b


@functools.lru_cache(maxsize=1)
def _chip_info():
    """Returns (physical_vmem_bytes, multi_tensorcore). Conservative on failure."""
    phys_vmem = 64 * 1024 * 1024
    multi_core = False
    try:
        info = pltpu.get_tpu_info()
        phys_vmem = int(getattr(info, "vmem_capacity_bytes", phys_vmem))
        cores = None
        for attr in ("num_tensorcores", "tensorcores_per_chip", "num_cores",
                     "cores_per_chip"):
            val = getattr(info, attr, None)
            if val:
                cores = int(val)
                break
        if cores is not None:
            multi_core = cores > 1
        else:
            # v7x is the only documented chip with <=64 MiB VMEM per TC and 2 TCs.
            multi_core = phys_vmem <= 64 * 1024 * 1024
    except Exception:
        pass  # query unavailable -> conservative defaults (48 MiB limit, 1 TC)
    return phys_vmem, multi_core


# ---------------------------------------------------------------------------
# Kernel: fused 2-layer MLP on one (tm, k*F_in) row tile of the packed matrix.
# ---------------------------------------------------------------------------
def mlp_as_gnn_kernel(x_ref, w1_ref, b1_ref, w2_ref, b2_ref, o_ref, *, mxu_dtype):
    x = x_ref[...]                                                   # (tm, k*F_in)
    w1 = w1_ref[...]
    w2 = w2_ref[...]
    if mxu_dtype is not None:                                        # bf16 MXU inputs
        x, w1, w2 = x.astype(mxu_dtype), w1.astype(mxu_dtype), w2.astype(mxu_dtype)
    h = jnp.dot(x, w1, preferred_element_type=jnp.float32)           # (tm, k*H)
    h = jnp.maximum(h + b1_ref[...].astype(jnp.float32), 0.0)
    if mxu_dtype is not None:
        h = h.astype(mxu_dtype)
    o = jnp.dot(h, w2, preferred_element_type=jnp.float32)           # (tm, k*F_out)
    o_ref[...] = (o + b2_ref[...].astype(jnp.float32)).astype(o_ref.dtype)


def _pack_factor(f_in, hidden, f_out, itemsize, weight_copies):
    """Rows folded into the lane axis so loads/stores are lane-dense (>=128)."""
    narrow = min(f_in, f_out)
    if narrow >= _LANE:
        return 1
    # k = cdiv(128, narrow) makes loads/stores lane-dense and exactly fills the
    # 128-wide v5e MXU K.  Guardrail: do NOT raise to fill a 256-wide K on
    # v6e/v7x -- block-diag MAC waste grows exactly as fast as the K-fill gain
    # (net zero MXU time) while doubling weight/intermediate VMEM.
    k = _cdiv(_LANE, narrow)
    raw = (f_in * hidden + hidden * f_out) * itemsize
    while k > 1 and weight_copies * k * k * raw > _WEIGHT_VMEM_BUDGET:
        k //= 2
    return max(k, 1)


def _block_diag(w, k):
    """(Fi, Fo) -> (k*Fi, k*Fo) block-diagonal matrix with k copies of w."""
    if k == 1:
        return w
    fi, fo = w.shape
    eye = jnp.eye(k, dtype=w.dtype)
    return (eye[:, None, :, None] * w[None, :, None, :]).reshape(k * fi, k * fo)


@functools.partial(jax.jit, static_argnames=("single_buffer_consts", "use_bf16_matmul"))
def _mlp_as_gnn_impl(x, w1, b1, w2, b2, *, single_buffer_consts=True,
                     use_bf16_matmul=False):
    if x.ndim == 3:
        B, N, F_in = x.shape
        x_flat = x.reshape(B * N, F_in)
    elif x.ndim == 2:
        x_flat = x
    else:
        raise ValueError("Input tensor must be 2D or 3D")

    M, F_in = x_flat.shape
    H = w1.shape[1]
    F_out = w2.shape[1]
    itemsize = jnp.dtype(x.dtype).itemsize

    phys_vmem, multi_core = _chip_info()
    # 96 MiB of the 128 MiB on v5e/v6e, 48 MiB of v7x's 64 MiB physical VMEM.
    vmem_limit = max(32 * 1024 * 1024,
                     min(96 * 1024 * 1024, phys_vmem - 16 * 1024 * 1024))

    weight_copies = 1 if single_buffer_consts else 2

    # --- lane packing: fold k rows into the lane axis (free row-major reshape) --
    k = _pack_factor(F_in, H, F_out, itemsize, weight_copies)
    kF_in, kH, kF_out = k * F_in, k * H, k * F_out

    # --- row tile: biggest tile that fits the VMEM budget -----------------------
    weight_bytes = weight_copies * itemsize * (kF_in * kH + kH * kF_out + kH + kF_out)
    # double-buffered x/out tiles + the live (tm, k*H) f32 layer-1 intermediate
    per_row_bytes = 2 * itemsize * (kF_in + kF_out) + 4 * kH
    tile_budget = max(1 * 1024 * 1024, vmem_limit - weight_bytes - _VMEM_HEADROOM)
    tm_cap = tile_budget // per_row_bytes
    tm_cap = max(_SUBLANE, min(_MAX_TM, (tm_cap // _SUBLANE) * _SUBLANE))

    Mp = _cdiv(M, k)                                    # packed rows actually needed
    # Multi-TC chips (v7x): >=4 grid steps so each core still double-buffers.
    # Single-TC chips (v5e/v6e): don't split work that already fits one tile.
    target_steps = 4 if multi_core else 1
    tm = min(tm_cap, max(_SUBLANE, _round_up(_cdiv(Mp, target_steps), _SUBLANE)))
    grid_steps = _cdiv(Mp, tm)

    # Pad only to a multiple of k (no-op when M % k == 0).  The ragged grid
    # boundary block is read/written with masking by Pallas; garbage boundary
    # rows never mix with real rows (no cross-row reduction).
    Mk = Mp * k
    if Mk != M:
        x_flat = jnp.pad(x_flat, ((0, Mk - M), (0, 0)))
    x_packed = x_flat.reshape(Mp, kF_in)                # metadata-only reshape

    w1p = _block_diag(w1, k)                            # (k*F_in, k*H)
    w2p = _block_diag(w2, k)                            # (k*H, k*F_out)
    b1p = jnp.tile(b1, k).reshape(1, kH)
    b2p = jnp.tile(b2, k).reshape(1, kF_out)

    # Weights/biases never change across the grid -> single-buffer them in VMEM.
    const_kwargs = {"pipeline_mode": pl.Buffered(1)} if single_buffer_consts else {}

    # True (k-inflated block-diag) MXU FLOPs so XLA schedules neighbors sensibly.
    cost = pl.CostEstimate(
        flops=2 * grid_steps * tm * (kF_in * kH + kH * kF_out),
        transcendentals=0,
        bytes_accessed=itemsize * (Mp * (kF_in + kF_out)
                                   + kF_in * kH + kH * kF_out + kH + kF_out),
    )

    kernel = functools.partial(
        mlp_as_gnn_kernel, mxu_dtype=jnp.bfloat16 if use_bf16_matmul else None)

    out_packed = pl.pallas_call(
        kernel,
        out_shape=jax.ShapeDtypeStruct((Mp, kF_out), x.dtype),
        grid_spec=pltpu.PrefetchScalarGridSpec(
            num_scalar_prefetch=0,
            grid=(grid_steps,),
            in_specs=[
                pl.BlockSpec((tm, kF_in), lambda i: (i, 0)),                    # x tile
                pl.BlockSpec((kF_in, kH), lambda i: (0, 0), **const_kwargs),    # W1 block-diag
                pl.BlockSpec((1, kH), lambda i: (0, 0), **const_kwargs),        # b1
                pl.BlockSpec((kH, kF_out), lambda i: (0, 0), **const_kwargs),   # W2 block-diag
                pl.BlockSpec((1, kF_out), lambda i: (0, 0), **const_kwargs),    # b2
            ],
            out_specs=pl.BlockSpec((tm, kF_out), lambda i: (i, 0)),
        ),
        compiler_params=pltpu.CompilerParams(
            dimension_semantics=("parallel",),
            vmem_limit_bytes=vmem_limit,
        ),
        cost_estimate=cost,
    )(x_packed, w1p, b1p, w2p, b2p)

    out_flat = out_packed.reshape(Mk, F_out)            # metadata-only reshape
    if Mk != M:
        out_flat = out_flat[:M]                         # only when M % k != 0
    if x.ndim == 3:
        return out_flat.reshape(B, N, F_out)
    return out_flat


def _supports_pipeline_mode():
    try:
        pl.BlockSpec((_SUBLANE, _LANE), lambda i: (0, 0), pipeline_mode=pl.Buffered(1))
        return True
    except (AttributeError, TypeError):
        return False


_SINGLE_BUFFER_CONSTS = _supports_pipeline_mode()


def mlp_as_gnn(x, w1, b1, w2, b2, *, use_bf16_matmul=False):
    """y = relu(x @ W1 + b1) @ W2 + b2 per node; x is (B, N, F_in) or (N, F_in).

    use_bf16_matmul=True casts MXU inputs to bf16 (f32 accumulation); keeps
    v5e/v7x HBM-bound but loosens parity with the f32 reference to ~1e-2.
    """
    # TODO(synk): activation='gelu' and dropout>0 module options are not wired in;
    # this implements the module's default forward (ReLU, dropout=0.0).
    global _SINGLE_BUFFER_CONSTS
    if _SINGLE_BUFFER_CONSTS:
        try:
            return _mlp_as_gnn_impl(x, w1, b1, w2, b2, single_buffer_consts=True,
                                    use_bf16_matmul=use_bf16_matmul)
        except Exception:
            # Mosaic build rejects pl.Buffered(1): retry once with double-buffered
            # consts (a genuine kernel error re-raises from the retry below).
            _SINGLE_BUFFER_CONSTS = False
    return _mlp_as_gnn_impl(x, w1, b1, w2, b2, single_buffer_consts=False,
                            use_bf16_matmul=use_bf16_matmul)


def init_params(key, in_channels, hidden_channels, out_channels, dtype=jnp.float32):
    """Mirror of the PyTorch init: kaiming_uniform_(a=sqrt(5)) on a (out, in)
    weight == U(-1/sqrt(fan_in), 1/sqrt(fan_in)); same bound for the bias.
    Weights are returned pre-transposed to (in, out) for row-major matmuls."""
    k1, k2, k3, k4 = jax.random.split(key, 4)

    bound1 = 1.0 / math.sqrt(in_channels)
    w1_t = jax.random.uniform(k1, (hidden_channels, in_channels),
                              minval=-bound1, maxval=bound1, dtype=dtype)
    b1 = jax.random.uniform(k2, (hidden_channels,), minval=-bound1, maxval=bound1,
                            dtype=dtype)

    bound2 = 1.0 / math.sqrt(hidden_channels)
    w2_t = jax.random.uniform(k3, (out_channels, hidden_channels),
                              minval=-bound2, maxval=bound2, dtype=dtype)
    b2 = jax.random.uniform(k4, (out_channels,), minval=-bound2, maxval=bound2,
                            dtype=dtype)

    return w1_t.T, b1, w2_t.T, b2


if __name__ == "__main__":
    key = jax.random.PRNGKey(0)
    kx, kx2, kp = jax.random.split(key, 3)

    B, N = 2, 8
    in_channels, hidden_channels, out_channels = 16, 32, 16

    w1, b1, w2, b2 = init_params(kp, in_channels, hidden_channels, out_channels)

    def ref_fn(xx):
        y = jnp.maximum(xx.reshape(-1, in_channels) @ w1 + b1, 0.0) @ w2 + b2
        return y.reshape(xx.shape[:-1] + (out_channels,))

    # Small 3D case (matches the module's (B, N, F) usage).
    x = jax.random.normal(kx, (B, N, in_channels), dtype=jnp.float32)
    out = jax.block_until_ready(mlp_as_gnn(x, w1, b1, w2, b2))
    assert out.shape == (B, N, out_channels)
    assert jnp.allclose(out, ref_fn(x), atol=1e-5, rtol=1e-5)

    # Larger ragged case: exercises M % k != 0 and the masked boundary block.
    x2 = jax.random.normal(kx2, (3, 50, in_channels), dtype=jnp.float32)
    out2 = jax.block_until_ready(mlp_as_gnn(x2, w1, b1, w2, b2))
    assert out2.shape == (3, 50, out_channels)
    assert jnp.allclose(out2, ref_fn(x2), atol=1e-5, rtol=1e-5)

    print("KERNEL_OK")
</pallas_src>

<mosaic_0001>
module attributes {stable_mosaic.version = 11 : i64} {
  func.func @mlp_as_gnn_kernel(%arg0: i32, %arg1: memref<8x128xf32, #tpu.memory_space<vmem>>, %arg2: memref<128x256xf32, #tpu.memory_space<vmem>>, %arg3: memref<1x256xf32, #tpu.memory_space<vmem>>, %arg4: memref<256x128xf32, #tpu.memory_space<vmem>>, %arg5: memref<1x128xf32, #tpu.memory_space<vmem>>, %arg6: memref<8x128xf32, #tpu.memory_space<vmem>>) attributes {dimension_semantics = [#tpu.dimension_semantics<parallel>], iteration_bounds = array<i64: 1>, scalar_prefetch = 0 : i64, scratch_operands = 0 : i64, tpu.core_type = #tpu.core_type<tc>, window_params = [{transform_indices = @transform_0, window_bounds = array<i64: 8, 128>}, {pipeline_mode = #tpu.pipeline_mode<synchronous>, transform_indices = @transform_1, window_bounds = array<i64: 128, 256>}, {pipeline_mode = #tpu.pipeline_mode<synchronous>, transform_indices = @transform_2, window_bounds = array<i64: 1, 256>}, {pipeline_mode = #tpu.pipeline_mode<synchronous>, transform_indices = @transform_3, window_bounds = array<i64: 256, 128>}, {pipeline_mode = #tpu.pipeline_mode<synchronous>, transform_indices = @transform_4, window_bounds = array<i64: 1, 128>}, {transform_indices = @transform_5, window_bounds = array<i64: 8, 128>}]} {
    %c0 = arith.constant 0 : index
    %c0_0 = arith.constant 0 : index
    %0 = vector.load %arg1[%c0, %c0_0] : memref<8x128xf32, #tpu.memory_space<vmem>>, vector<8x128xf32>
    %c0_1 = arith.constant 0 : index
    %c0_2 = arith.constant 0 : index
    %1 = vector.load %arg2[%c0_1, %c0_2] : memref<128x256xf32, #tpu.memory_space<vmem>>, vector<128x256xf32>
    %c0_3 = arith.constant 0 : index
    %c0_4 = arith.constant 0 : index
    %2 = vector.load %arg4[%c0_3, %c0_4] : memref<256x128xf32, #tpu.memory_space<vmem>>, vector<256x128xf32>
    %cst = arith.constant dense<0.000000e+00> : vector<8x256xf32>
    %3 = tpu.matmul %0, %1, %cst {dimension_numbers = #tpu.dot_dimension_numbers<[1], [0], [0], [1], [0, 0, 1, 1], [], []>} : vector<8x128xf32>, vector<128x256xf32>, vector<8x256xf32> -> vector<8x256xf32>
    %c0_5 = arith.constant 0 : index
    %c0_6 = arith.constant 0 : index
    %4 = vector.load %arg3[%c0_5, %c0_6] : memref<1x256xf32, #tpu.memory_space<vmem>>, vector<1x256xf32>
    %5 = vector.broadcast %4 : vector<1x256xf32> to vector<8x256xf32>
    %6 = arith.addf %3, %5 : vector<8x256xf32>
    %cst_7 = arith.constant 0.000000e+00 : f32
    %7 = vector.broadcast %cst_7 : f32 to vector<8x256xf32>
    %8 = arith.maximumf %6, %7 : vector<8x256xf32>
    %cst_8 = arith.constant dense<0.000000e+00> : vector<8x128xf32>
    %9 = tpu.matmul %8, %2, %cst_8 {dimension_numbers = #tpu.dot_dimension_numbers<[1], [0], [0], [1], [0, 0, 1, 1], [], []>} : vector<8x256xf32>, vector<256x128xf32>, vector<8x128xf32> -> vector<8x128xf32>
    %c0_9 = arith.constant 0 : index
    %c0_10 = arith.constant 0 : index
    %10 = vector.load %arg5[%c0_9, %c0_10] : memref<1x128xf32, #tpu.memory_space<vmem>>, vector<1x128xf32>
    %11 = vector.broadcast %10 : vector<1x128xf32> to vector<8x128xf32>
    %12 = arith.addf %9, %11 : vector<8x128xf32>
    %c0_11 = arith.constant 0 : index
    %c0_12 = arith.constant 0 : index
    %13 = vector.load %arg6[%c0_11, %c0_12] : memref<8x128xf32, #tpu.memory_space<vmem>>, vector<8x128xf32>
    tpu.vector_store %arg6[%c0_11, %c0_12], %12 {strides = array<i32>} : memref<8x128xf32, #tpu.memory_space<vmem>>, vector<8x128xf32>,
    return
  }
  func.func @transform_0(%arg0: i32) -> (i32, i32) {
    %c0_i32 = arith.constant 0 : i32
    %c0_i32_0 = arith.constant 0 : i32
    return %arg0, %c0_i32 : i32, i32
  }
  func.func @transform_1(%arg0: i32) -> (i32, i32) {
    %c0_i32 = arith.constant 0 : i32
    %c0_i32_0 = arith.constant 0 : i32
    %c0_i32_1 = arith.constant 0 : i32
    return %c0_i32, %c0_i32_0 : i32, i32
  }
  func.func @transform_2(%arg0: i32) -> (i32, i32) {
    %c0_i32 = arith.constant 0 : i32
    %c0_i32_0 = arith.constant 0 : i32
    %c0_i32_1 = arith.constant 0 : i32
    return %c0_i32, %c0_i32_0 : i32, i32
  }
  func.func @transform_3(%arg0: i32) -> (i32, i32) {
    %c0_i32 = arith.constant 0 : i32
    %c0_i32_0 = arith.constant 0 : i32
    %c0_i32_1 = arith.constant 0 : i32
    return %c0_i32, %c0_i32_0 : i32, i32
  }
  func.func @transform_4(%arg0: i32) -> (i32, i32) {
    %c0_i32 = arith.constant 0 : i32
    %c0_i32_0 = arith.constant 0 : i32
    %c0_i32_1 = arith.constant 0 : i32
    return %c0_i32, %c0_i32_0 : i32, i32
  }
  func.func @transform_5(%arg0: i32) -> (i32, i32) {
    %c0_i32 = arith.constant 0 : i32
    %c0_i32_0 = arith.constant 0 : i32
    return %arg0, %c0_i32 : i32, i32
  }
}

module attributes {stable_mosaic.version = 11 : i64} {
  func.func @mlp_as_gnn_kernel(%arg0: i32, %arg1: memref<8x128xf32, #tpu.memory_space<vmem>>, %arg2: memref<128x256xf32, #tpu.memory_space<vmem>>, %arg3: memref<1x256xf32, #tpu.memory_space<vmem>>, %arg4: memref<256x128xf32, #tpu.memory_space<vmem>>, %arg5: memref<1x128xf32, #tpu.memory_space<vmem>>, %arg6: memref<8x128xf32, #tpu.memory_space<vmem>>) attributes {dimension_semantics = [#tpu.dimension_semantics<parallel>], iteration_bounds = array<i64: 1>, scalar_prefetch = 0 : i64, scratch_operands = 0 : i64, tpu.core_type = #tpu.core_type<tc>, window_params = [{transform_indices = @transform_0, window_bounds = array<i64: 8, 128>}, {pipeline_mode = #tpu.pipeline_mode<synchronous>, transform_indices = @transform_1, window_bounds = array<i64: 128, 256>}, {pipeline_mode = #tpu.pipeline_mode<synchronous>, transform_indices = @transform_2, window_bounds = array<i64: 1, 256>}, {pipeline_mode = #tpu.pipeline_mode<synchronous>, transform_indices = @transform_3, window_bounds = array<i64: 256, 128>}, {pipeline_mode = #tpu.pipeline_mode<synchronous>, transform_indices = @transform_4, window_bounds = array<i64: 1, 128>}, {transform_indices = @transform_5, window_bounds = array<i64: 8, 128>}]} {
    %c0 = arith.constant 0 : index
    %c0_0 = arith.constant 0 : index
    %0 = vector.load %arg1[%c0, %c0_0] : memref<8x128xf32, #tpu.memory_space<vmem>>, vector<8x128xf32>
    %c0_1 = arith.constant 0 : index
    %c0_2 = arith.constant 0 : index
    %1 = vector.load %arg2[%c0_1, %c0_2] : memref<128x256xf32, #tpu.memory_space<vmem>>, vector<128x256xf32>
    %c0_3 = arith.constant 0 : index
    %c0_4 = arith.constant 0 : index
    %2 = vector.load %arg4[%c0_3, %c0_4] : memref<256x128xf32, #tpu.memory_space<vmem>>, vector<256x128xf32>
    %cst = arith.constant dense<0.000000e+00> : vector<8x256xf32>
    %3 = tpu.matmul %0, %1, %cst {dimension_numbers = #tpu.dot_dimension_numbers<[1], [0], [0], [1], [0, 0, 1, 1], [], []>} : vector<8x128xf32>, vector<128x256xf32>, vector<8x256xf32> -> vector<8x256xf32>
    %c0_5 = arith.constant 0 : index
    %c0_6 = arith.constant 0 : index
    %4 = vector.load %arg3[%c0_5, %c0_6] : memref<1x256xf32, #tpu.memory_space<vmem>>, vector<1x256xf32>
    %5 = vector.broadcast %4 : vector<1x256xf32> to vector<8x256xf32>
    %6 = arith.addf %3, %5 : vector<8x256xf32>
    %cst_7 = arith.constant 0.000000e+00 : f32
    %7 = vector.broadcast %cst_7 : f32 to vector<8x256xf32>
    %8 = arith.maximumf %6, %7 : vector<8x256xf32>
    %cst_8 = arith.constant dense<0.000000e+00> : vector<8x128xf32>
    %9 = tpu.matmul %8, %2, %cst_8 {dimension_numbers = #tpu.dot_dimension_numbers<[1], [0], [0], [1], [0, 0, 1, 1], [], []>} : vector<8x256xf32>, vector<256x128xf32>, vector<8x128xf32> -> vector<8x128xf32>
    %c0_9 = arith.constant 0 : index
    %c0_10 = arith.constant 0 : index
    %10 = vector.load %arg5[%c0_9, %c0_10] : memref<1x128xf32, #tpu.memory_space<vmem>>, vector<1x128xf32>
    %11 = vector.broadcast %10 : vector<1x128xf32> to vector<8x128xf32>
    %12 = arith.addf %9, %11 : vector<8x128xf32>
    %c0_11 = arith.constant 0 : index
    %c0_12 = arith.constant 0 : index
    %13 = vector.load %arg6[%c0_11, %c0_12] : memref<8x128xf32, #tpu.memory_space<vmem>>, vector<8x128xf32>
    tpu.vector_store %arg6[%c0_11, %c0_12], %12 {strides = array<i32>} : memref<8x128xf32, #tpu.memory_space<vmem>>, vector<8x128xf32>,
    return
  }
  func.func @transform_0(%arg0: i32) -> (i32, i32) {
    %c0_i32 = arith.constant 0 : i32
    %c0_i32_0 = arith.constant 0 : i32
    return %arg0, %c0_i32 : i32, i32
  }
  func.func @transform_1(%arg0: i32) -> (i32, i32) {
    %c0_i32 = arith.constant 0 : i32
    %c0_i32_0 = arith.constant 0 : i32
    %c0_i32_1 = arith.constant 0 : i32
    return %c0_i32, %c0_i32_0 : i32, i32
  }
  func.func @transform_2(%arg0: i32) -> (i32, i32) {
    %c0_i32 = arith.constant 0 : i32
    %c0_i32_0 = arith.constant 0 : i32
    %c0_i32_1 = arith.constant 0 : i32
    return %c0_i32, %c0_i32_0 : i32, i32
  }
  func.func @transform_3(%arg0: i32) -> (i32, i32) {
    %c0_i32 = arith.constant 0 : i32
    %c0_i32_0 = arith.constant 0 : i32
    %c0_i32_1 = arith.constant 0 : i32
    return %c0_i32, %c0_i32_0 : i32, i32
  }
  func.func @transform_4(%arg0: i32) -> (i32, i32) {
    %c0_i32 = arith.constant 0 : i32
    %c0_i32_0 = arith.constant 0 : i32
    %c0_i32_1 = arith.constant 0 : i32
    return %c0_i32, %c0_i32_0 : i32, i32
  }
  func.func @transform_5(%arg0: i32) -> (i32, i32) {
    %c0_i32 = arith.constant 0 : i32
    %c0_i32_0 = arith.constant 0 : i32
    return %arg0, %c0_i32 : i32, i32
  }
}

</mosaic_0001>

<bundles_post_ra>
// kernel: tile.13
= control target key start
LH: loop header
LB: loop body
LE: loop exit
PB: predicated region body
PF: predicated region fallthrough
CT: control target
= control target key end

     0   :  { %s22_s0 = inlined_call_operand.vmem [shape: f32[32], index: 0, kind: input, shape index: {}]   ;;  %s23_s1 = inlined_call_operand.vmem [shape: f32[8,32], index: 1, kind: output, shape index: {}]  }
   0x1   :  { %v4_v0 = vld [vmem:[%s22_s0] ss:$0 sm:$0xff] }
   0x2   :  { %5 = vst [vmem:[%s23_s1] sm:$0xff] %v4_v0 }

// kernel: tile.14
= control target key start
LH: loop header
LB: loop body
LE: loop exit
PB: predicated region body
PF: predicated region fallthrough
CT: control target
= control target key end

     0   :  { %s7_s6 = smov 3  ;;  %s14_s9 = smov 3  ;;  %vm4_vm0 = vcmask 261120   ;;  %vm11_vm1 = vcmask 1048320   ;;  %vm18_vm2 = vcmask 785920   ;;  %vm25_vm3 = vcmask 523520   ;;  %s76_s0 = inlined_call_operand.vmem [shape: f32[8,32], index: 0, kind: input, shape index: {}]   ;;  %s77_s1 = inlined_call_operand.vmem [shape: f32[1,256], index: 1, kind: output, shape index: {}]  }
   0x1   :  { %v38_v0 = vld [vmem:[%s76_s0 + $0x3] ss:$4 sm:%s7_s6]   ;;  %s45_s10 = smov 96   ;;  %s21_s11 = smov 3  ;;  %v39_v1 = vld [vmem:[%s76_s0 + $0x2] ss:$4 sm:%s14_s9]  }
   0x2   :  { %9 = vrot.lane.b32.xlu0 %v38_v0, %s45_s10  ;;  %v40_v2 = vld [vmem:[%s76_s0 + $0x1] ss:$4 sm:%s21_s11]   ;;  %s2_s16 = smov 3  ;;  %s46_s17 = smov 32  }
   0x3   :  { %23 = vrot.lane.b32.xlu1 %v40_v2, %s46_s17  ;;  %v3_v3 = vld [vmem:[%s76_s0] ss:$4 sm:%s2_s16]   ;;  %s47_s0 = smov 64  }
   0x4   :  { %5 = vst.msk [vmem:[#allocation0] ss:$8 sm:$0x3] %vm4_vm0, %v3_v3  }
   0x6   :  { %16 = vrot.lane.b32.xlu0 %v39_v1, %s47_s0 }
  0x74   :  { %v10_v4 = vpop.permute.xlu0 %9  }
  0x75   :  { %12 = vst.msk [vmem:[#allocation0] ss:$8 sm:$0x3] %vm11_vm1, %v10_v4   ;;  %v24_v5 = vpop.permute.xlu1 %23  }
  0x78   :  { %v17_v6 = vpop.permute.xlu0 %16  }
  0x79   :  { %19 = vst.msk [vmem:[#allocation0] ss:$8 sm:$0x3] %vm18_vm2, %v17_v6  }
  0x7a   :  { %26 = vst.msk [vmem:[#allocation0] ss:$8 sm:$0x3] %vm25_vm3, %v24_v5  }
  0x81   :  { %v30_v7 = vld [vmem:[#allocation0] sm:$0x1]  ;;  %v34_v8 = vld [vmem:[#allocation0 + $0x8] sm:$0x1] }
  0x82   :  { %32 = vst [vmem:[%s77_s1] sm:$0x1] %v30_v7  ;;  %41 = vst [vmem:[%s77_s1 + $0x1] sm:$0x1] %v34_v8 }

// kernel: tile.18
= control target key start
LH: loop header
LB: loop body
LE: loop exit
PB: predicated region body
PF: predicated region fallthrough
CT: control target
= control target key end

     0   :  { %s22_s0 = inlined_call_operand.vmem [shape: f32[16], index: 0, kind: input, shape index: {}]   ;;  %s23_s1 = inlined_call_operand.vmem [shape: f32[8,16], index: 1, kind: output, shape index: {}]  }
   0x1   :  { %v4_v0 = vld [vmem:[%s22_s0] ss:$0 sm:$0xff] }
   0x2   :  { %5 = vst [vmem:[%s23_s1] sm:$0xff] %v4_v0 }

// kernel: tile.19
= control target key start
LH: loop header
LB: loop body
LE: loop exit
PB: predicated region body
PF: predicated region fallthrough
CT: control target
= control target key end

     0   :  { %s67_s10 = smov 112   ;;  %s68_s11 = smov 80   ;;  %vm3_vm0 = vcmask 130048   ;;  %vm9_vm1 = vcmask 1048448   ;;  %vm15_vm2 = vcmask 917248   ;;  %vm21_vm3 = vcmask 786048   ;;  %s111_s0 = inlined_call_operand.vmem [shape: f32[8,16], index: 0, kind: input, shape index: {}]   ;;  %s112_s1 = inlined_call_operand.vmem [shape: f32[1,128], index: 1, kind: output, shape index: {}]  }
   0x1   :  { %v53_v0 = vld [vmem:[%s111_s0 + $0x7] sm:$0x1]   ;;  %v55_v1 = vld [vmem:[%s111_s0 + $0x5] sm:$0x1]   ;;  %v54_v2 = vld [vmem:[%s111_s0 + $0x6] sm:$0x1]  }
   0x2   :  { %7 = vrot.lane.b32.xlu0 %v53_v0, %s67_s10  ;;  %19 = vrot.lane.b32.xlu1 %v55_v1, %s68_s11  ;;  %v56_v3 = vld [vmem:[%s111_s0 + $0x4] sm:$0x1]   ;;  %v2_v4 = vld [vmem:[%s111_s0] sm:$0x1]   ;;  %s69_s18 = smov 96   ;;  %s70_s19 = smov 64  }
   0x3   :  { %4 = vst.msk [vmem:[#allocation0] sm:$0x1] %vm3_vm0, %v2_v4   ;;  %v57_v5 = vld [vmem:[%s111_s0 + $0x3] sm:$0x1]   ;;  %v58_v6 = vld [vmem:[%s111_s0 + $0x2] sm:$0x1]  }
   0x4   :  { %s71_s24 = smov 48   ;;  %s72_s25 = smov 32   ;;  %v59_v7 = vld [vmem:[%s111_s0 + $0x1] sm:$0x1]   ;;  %vm27_vm4 = vcmask 654848   ;;  %vm33_vm5 = vcmask 523648  }
   0x5   :  { %s73_s0 = smov 16   ;;  %vm39_vm6 = vcmask 392448   ;;  %vm45_vm7 = vcmask 261248  }
   0x6   :  { %13 = vrot.lane.b32.xlu0 %v54_v2, %s69_s18  ;;  %25 = vrot.lane.b32.xlu1 %v56_v3, %s70_s19 }
   0xa   :  { %31 = vrot.lane.b32.xlu0 %v57_v5, %s71_s24  ;;  %37 = vrot.lane.b32.xlu1 %v58_v6, %s72_s25 }
   0xe   :  { %43 = vrot.lane.b32.xlu0 %v59_v7, %s73_s0 }
  0x74   :  { %v8_v8 = vpop.permute.xlu0 %7   ;;  %v20_v9 = vpop.permute.xlu1 %19  }
  0x75   :  { %10 = vst.msk [vmem:[#allocation0] sm:$0x1] %vm9_vm1, %v8_v8  }
  0x78   :  { %v14_v10 = vpop.permute.xlu0 %13   ;;  %v26_v11 = vpop.permute.xlu1 %25  }
  0x79   :  { %16 = vst.msk [vmem:[#allocation0] sm:$0x1] %vm15_vm2, %v14_v10  }
  0x7a   :  { %22 = vst.msk [vmem:[#allocation0] sm:$0x1] %vm21_vm3, %v20_v9  }
  0x7b   :  { %28 = vst.msk [vmem:[#allocation0] sm:$0x1] %vm27_vm4, %v26_v11  }
  0x7c   :  { %v32_v12 = vpop.permute.xlu0 %31   ;;  %v38_v13 = vpop.permute.xlu1 %37  }
  0x7d   :  { %34 = vst.msk [vmem:[#allocation0] sm:$0x1] %vm33_vm5, %v32_v12  }
  0x7e   :  { %40 = vst.msk [vmem:[#allocation0] sm:$0x1] %vm39_vm6, %v38_v13  }
  0x80   :  { %v44_v14 = vpop.permute.xlu0 %43  }
  0x81   :  { %46 = vst.msk [vmem:[#allocation0] sm:$0x1] %vm45_vm7, %v44_v14  }
  0x88   :  { %v50_v15 = vld [vmem:[#allocation0] sm:$0x1] }
  0x89   :  { %52 = vst [vmem:[%s112_s1] sm:$0x1] %v50_v15 }

// kernel: _mlp_as_gnn_impl.1
= control target key start
LH: loop header
LB: loop body
LE: loop exit
PB: predicated region body
PF: predicated region fallthrough
CT: control target
= control target key end

     0   :  { %v388_v7 = vmov 0.0   ;;  %s623_s0 = inlined_call_operand.vmem [shape: f32[2,128], index: 0, kind: input, shape index: {}]   ;;  %s624_s1 = inlined_call_operand.vmem [shape: f32[128,256], index: 1, kind: input, shape index: {}]   ;;  %s625_s2 = inlined_call_operand.vmem [shape: f32[1,256], index: 2, kind: input, shape index: {}]   ;;  %s626_s3 = inlined_call_operand.vmem [shape: f32[256,128], index: 3, kind: input, shape index: {}]   ;;  %s627_s4 = inlined_call_operand.vmem [shape: f32[1,128], index: 4, kind: input, shape index: {}]   ;;  %s628_s5 = inlined_call_operand.vmem [shape: f32[2,128], index: 5, kind: output, shape index: {}]  }
   0x1   :  { %v22_v0 = vld [vmem:[%s624_s1 + $0x8] sm:$0xff]  ;;  %v24_v1 = vld [vmem:[%s624_s1 + $0x18] sm:$0xff]  ;;  %v21_v2 = vld [vmem:[%s624_s1] sm:$0xff]  ;;  %161 = vmatprep.mubr.f32.mxu0 %v388_v7 }
   0x2   :  { %v323_v3 = vpack.c.bf16 %v24_v1, %v22_v0  ;;  %v23_v4 = vld [vmem:[%s624_s1 + $0x10] sm:$0xff]  ;;  %v26_v5 = vld [vmem:[%s624_s1 + $0x28] sm:$0xff]  ;;  %v28_v6 = vld [vmem:[%s624_s1 + $0x38] sm:$0xff] }
   0x3   :  { %v325_v8 = vpack.c.bf16 %v23_v4, %v21_v2  ;;  %v327_v9 = vpack.c.bf16 %v28_v6, %v26_v5  ;;  %v25_v10 = vld [vmem:[%s624_s1 + $0x20] sm:$0xff]  ;;  %v27_v11 = vld [vmem:[%s624_s1 + $0x30] sm:$0xff]  ;;  %v30_v12 = vld [vmem:[%s624_s1 + $0x48] sm:$0xff] }
   0x4   :  { %324 = vmatprep.subr.bf16.mxu0 %v323_v3  ;;  %v32_v13 = vld [vmem:[%s624_s1 + $0x58] sm:$0xff]  ;;  %v329_v14 = vpack.c.bf16 %v27_v11, %v25_v10  ;;  %v29_v16 = vld [vmem:[%s624_s1 + $0x40] sm:$0xff]  ;;  %v31_v17 = vld [vmem:[%s624_s1 + $0x50] sm:$0xff] }
   0x5   :  { %326 = vmatpush1.bf16.msra.mxu0 %v325_v8  ;;  %v331_v15 = vpack.c.bf16 %v32_v13, %v30_v12  ;;  %v34_v18 = vld [vmem:[%s624_s1 + $0x68] sm:$0xff]  ;;  %v36_v19 = vld [vmem:[%s624_s1 + $0x78] sm:$0xff]  ;;  %v333_v20 = vpack.c.bf16 %v31_v17, %v29_v16  ;;  %v33_v22 = vld [vmem:[%s624_s1 + $0x60] sm:$0xff] }
   0x6   :  { %328 = vmatprep.subr.bf16.mxu0 %v327_v9  ;;  %v335_v21 = vpack.c.bf16 %v36_v19, %v34_v18  ;;  %v35_v23 = vld [vmem:[%s624_s1 + $0x70] sm:$0xff]  ;;  %v38_v24 = vld [vmem:[%s624_s1 + $0x88] sm:$0xff]  ;;  %v40_v25 = vld [vmem:[%s624_s1 + $0x98] sm:$0xff] }
   0x7   :  { %v37_v26 = vld [vmem:[%s624_s1 + $0x80] sm:$0xff]  ;;  %v39_v27 = vld [vmem:[%s624_s1 + $0x90] sm:$0xff]  ;;  %v70_v29 = vld [vmem:[%s626_s3 + $0x88] sm:$0xff]  ;;  %v337_v31 = vpack.c.bf16 %v35_v23, %v33_v22  ;;  %v339_v36 = vpack.c.bf16 %v40_v25, %v38_v24 }
   0x8   :  { %v69_v28 = vld [vmem:[%s626_s3 + $0x80] sm:$0xff]  ;;  %v54_v33 = vld [vmem:[%s626_s3 + $0x8] sm:$0xff]  ;;  %v71_v34 = vld [vmem:[%s626_s3 + $0x90] sm:$0xff]  ;;  %v341_v46 = vpack.c.bf16 %v39_v27, %v37_v26 }
   0x9   :  { %330 = vmatpush1.bf16.msra.mxu0 %v329_v14  ;;  %v53_v30 = vld [vmem:[%s626_s3] sm:$0xff]  ;;  %v355_v32 = vpack.c.bf16 %v70_v29, %v69_v28  ;;  %v72_v35 = vld [vmem:[%s626_s3 + $0x98] sm:$0xff]  ;;  %v55_v39 = vld [vmem:[%s626_s3 + $0x10] sm:$0xff] }
   0xa   :  { %332 = vmatprep.subr.bf16.mxu0 %v331_v15  ;;  %v357_v37 = vpack.c.bf16 %v54_v33, %v53_v30  ;;  %v359_v38 = vpack.c.bf16 %v72_v35, %v71_v34  ;;  %v56_v40 = vld [vmem:[%s626_s3 + $0x18] sm:$0xff]  ;;  %v73_v41 = vld [vmem:[%s626_s3 + $0xa0] sm:$0xff]  ;;  %v42_v42 = vld [vmem:[%s624_s1 + $0xa8] sm:$0xff]  ;;  %v87_v34 = vlaneseq }
   0xb   :  { %v44_v43 = vld [vmem:[%s624_s1 + $0xb8] sm:$0xff]  ;;  %356 = vmatprep.subr.bf16.mxu1 %v355_v32  ;;  %v74_v44 = vld [vmem:[%s626_s3 + $0xa8] sm:$0xff]  ;;  %v361_v45 = vpack.c.bf16 %v56_v40, %v55_v39  ;;  %v41_v47 = vld [vmem:[%s624_s1 + $0xa0] sm:$0xff] }
   0xc   :  { %358 = vmatpush3.bf16.msra.mxu1 %v357_v37  ;;  %v363_v48 = vpack.c.bf16 %v74_v44, %v73_v41  ;;  %v57_v49 = vld [vmem:[%s626_s3 + $0x20] sm:$0xff]  ;;  %v58_v50 = vld [vmem:[%s626_s3 + $0x28] sm:$0xff]  ;;  %v343_v51 = vpack.c.bf16 %v44_v43, %v42_v42  ;;  %v43_v52 = vld [vmem:[%s624_s1 + $0xb0] sm:$0xff]  ;;  %v88_v35 = vshrl.u32 %v87_v34, 7 }
   0xd   :  { %334 = vmatpush1.bf16.msra.mxu0 %v333_v20  ;;  %360 = vmatprep.subr.bf16.mxu1 %v359_v38  ;;  %v75_v53 = vld [vmem:[%s626_s3 + $0xb0] sm:$0xff]  ;;  %v76_v54 = vld [vmem:[%s626_s3 + $0xb8] sm:$0xff]  ;;  %v46_v55 = vld [vmem:[%s624_s1 + $0xc8] sm:$0xff]  ;;  %v365_v57 = vpack.c.bf16 %v58_v50, %v57_v49  ;;  %v345_v58 = vpack.c.bf16 %v43_v52, %v41_v47 }
   0xe   :  { %336 = vmatprep.subr.bf16.mxu0 %v335_v21  ;;  %v48_v56 = vld [vmem:[%s624_s1 + $0xd8] sm:$0xff]  ;;  %v45_v59 = vld [vmem:[%s624_s1 + $0xc0] sm:$0xff]  ;;  %v367_v60 = vpack.c.bf16 %v76_v54, %v75_v53  ;;  %v59_v61 = vld [vmem:[%s626_s3 + $0x30] sm:$0xff]  ;;  %v93_v38 = vsub.s32 1, %v88_v35 }
   0xf   :  { %v60_v62 = vld [vmem:[%s626_s3 + $0x38] sm:$0xff]  ;;  %v347_v63 = vpack.c.bf16 %v48_v56, %v46_v55  ;;  %v47_v0 = vld [vmem:[%s624_s1 + $0xd0] sm:$0xff]  ;;  %v77_v1 = vld [vmem:[%s626_s3 + $0xc0] sm:$0xff] }
  0x10   :  { %362 = vmatpush3.bf16.msra.mxu1 %v361_v45  ;;  %v78_v2 = vld [vmem:[%s626_s3 + $0xc8] sm:$0xff]  ;;  %v52_v4 = vld [vmem:[%s624_s1 + $0xf8] sm:$0xff]  ;;  %v369_v5 = vpack.c.bf16 %v60_v62, %v59_v61  ;;  %v349_v6 = vpack.c.bf16 %v47_v0, %v45_v59  ;;  %v49_v7 = vld [vmem:[%s624_s1 + $0xe0] sm:$0xff] }
  0x11   :  { %338 = vmatpush1.bf16.msra.mxu0 %v337_v31  ;;  %364 = vmatprep.subr.bf16.mxu1 %v363_v48  ;;  %v50_v3 = vld [vmem:[%s624_s1 + $0xe8] sm:$0xff]  ;;  %v371_v8 = vpack.c.bf16 %v78_v2, %v77_v1  ;;  %v61_v9 = vld [vmem:[%s626_s3 + $0x40] sm:$0xff]  ;;  %v51_v12 = vld [vmem:[%s624_s1 + $0xf0] sm:$0xff] }
  0x12   :  { %340 = vmatprep.subr.bf16.mxu0 %v339_v36  ;;  %v62_v10 = vld [vmem:[%s626_s3 + $0x48] sm:$0xff]  ;;  %v351_v11 = vpack.c.bf16 %v52_v4, %v50_v3  ;;  %v79_v13 = vld [vmem:[%s626_s3 + $0xd0] sm:$0xff]  ;;  %v80_v14 = vld [vmem:[%s626_s3 + $0xd8] sm:$0xff]  ;;  %v353_v16 = vpack.c.bf16 %v51_v12, %v49_v7  ;;  %v89_v36 = vsub.s32 0, %v88_v35 }
  0x13   :  { %v373_v15 = vpack.c.bf16 %v62_v10, %v61_v9  ;;  %v375_v17 = vpack.c.bf16 %v80_v14, %v79_v13  ;;  %v63_v18 = vld [vmem:[%s626_s3 + $0x50] sm:$0xff]  ;;  %v64_v19 = vld [vmem:[%s626_s3 + $0x58] sm:$0xff]  ;;  %v81_v20 = vld [vmem:[%s626_s3 + $0xe0] sm:$0xff] }
  0x14   :  { %366 = vmatpush3.bf16.msra.mxu1 %v365_v57  ;;  %v82_v21 = vld [vmem:[%s626_s3 + $0xe8] sm:$0xff]  ;;  %v377_v22 = vpack.c.bf16 %v64_v19, %v63_v18  ;;  %v20_v23 = vld [vmem:[%s623_s0] sm:$0xff]  ;;  %v83_v28 = vld [vmem:[%s626_s3 + $0xf0] sm:$0xff] }
  0x15   :  { %342 = vmatpush1.bf16.msra.mxu0 %v341_v46  ;;  %368 = vmatprep.subr.bf16.mxu1 %v367_v60  ;;  %v379_v24 = vpack.c.bf16 %v82_v21, %v81_v20  ;;  %v65_v25 = vld [vmem:[%s626_s3 + $0x60] sm:$0xff]  ;;  %v66_v26 = vld [vmem:[%s626_s3 + $0x68] sm:$0xff]  ;;  %v84_v29 = vld [vmem:[%s626_s3 + $0xf8] sm:$0xff] }
  0x16   :  { %344 = vmatprep.subr.bf16.mxu0 %v343_v51  ;;  %v381_v27 = vpack.c.bf16 %v66_v26, %v65_v25  ;;  %v383_v30 = vpack.c.bf16 %v84_v29, %v83_v28  ;;  %v67_v31 = vld [vmem:[%s626_s3 + $0x70] sm:$0xff]  ;;  %v68_v32 = vld [vmem:[%s626_s3 + $0x78] sm:$0xff]  ;;  %v85_v37 = vld [vmem:[%s625_s2] sm:$0x3] }
  0x17   :  { %v385_v33 = vpack.c.bf16 %v68_v32, %v67_v31  ;;  %v90_v39 = vrot.slane %v85_v37, %v89_v36  ;;  %v94_v40 = vrot.slane %v85_v37, %v93_v38  ;;  %v287_v48 = vld [vmem:[%s627_s4] ss:$0 sm:$0xff] }
  0x18   :  { %370 = vmatpush3.bf16.msra.mxu1 %v369_v5 }
  0x19   :  { %346 = vmatpush1.bf16.msra.mxu0 %v345_v58  ;;  %372 = vmatprep.subr.bf16.mxu1 %v371_v8 }
  0x1a   :  { %348 = vmatprep.subr.bf16.mxu0 %v347_v63 }
  0x1c   :  { %374 = vmatpush3.bf16.msra.mxu1 %v373_v15 }
  0x1d   :  { %350 = vmatpush1.bf16.msra.mxu0 %v349_v6  ;;  %376 = vmatprep.subr.bf16.mxu1 %v375_v17 }
  0x1e   :  { %352 = vmatprep.subr.bf16.mxu0 %v351_v11 }
  0x20   :  { %378 = vmatpush3.bf16.msra.mxu1 %v377_v22 }
  0x21   :  { %354 = vmatpush1.bf16.msra.mxu0 %v353_v16  ;;  %380 = vmatprep.subr.bf16.mxu1 %v379_v24 }
  0x24   :  { %162 = vmatmul.mubr.f32.vlgmr.msra.gmra.mrb[0].mxu0 %v20_v23  ;;  %382 = vmatpush3.bf16.msra.mxu1 %v381_v27 }
  0x25   :  { %384 = vmatprep.subr.bf16.mxu1 %v383_v30 }
  0x28   :  { %386 = vmatpush3.bf16.msra.mxu1 %v385_v33 }
  0xf7   :  { %v163_v41 = vpop.f32.mrb[0].mxu0 }
  0xf8   :  { %v164_v42 = vadd.f32 %v163_v41, %v90_v39  ;;  %v165_v43 = vpop.f32.mrb[1].mxu0 }
  0xf9   :  { %v166_v44 = vadd.f32 %v165_v43, %v94_v40 }
  0xfa   :  { %v168_v46 = vmax.f32 %v164_v42, 0.0 }
  0xfb   :  { %v169_v45 = vmax.f32 %v166_v44, 0.0 }
  0xfd   :  { %241 = vmatprep.mubr.f32.mxu1 %v169_v45 }
  0xfe   :  { %242 = vmatmul.mubr.f32.vlgmr.msra.gmra.mrb[0].mxu1 %v168_v46 }
 0x1d1   :  { %v320_v47 = vpop.f32.mrb[0].mxu1 }
 0x1d2   :  { %v321_v49 = vpop.f32.mrb[1].mxu1 }
 0x1d3   :  { %v322_v50 = vadd.f32 %v321_v49, %v320_v47 }
 0x1d5   :  { %v244_v51 = vadd.f32 %v322_v50, %v287_v48 }
 0x1d7   :  { %247 = vst [vmem:[#allocation2] sm:$0xff] %v244_v51 }
 0x1de   :  { %v265_v52 = vld [vmem:[#allocation2] sm:$0x3] }
 0x1df   :  { %266 = vst [vmem:[%s628_s5] sm:$0x3] %v265_v52 }

// kernel: tile.13
= control target key start
LH: loop header
LB: loop body
LE: loop exit
PB: predicated region body
PF: predicated region fallthrough
CT: control target
= control target key end

     0   :  { %s22_s0 = inlined_call_operand.vmem [shape: f32[32], index: 0, kind: input, shape index: {}]   ;;  %s23_s1 = inlined_call_operand.vmem [shape: f32[8,32], index: 1, kind: output, shape index: {}]  }
   0x1   :  { %v4_v0 = vld [vmem:[%s22_s0] ss:$0 sm:$0xff] }
   0x2   :  { %5 = vst [vmem:[%s23_s1] sm:$0xff] %v4_v0 }

// kernel: tile.14
= control target key start
LH: loop header
LB: loop body
LE: loop exit
PB: predicated region body
PF: predicated region fallthrough
CT: control target
= control target key end

     0   :  { %s7_s6 = smov 3  ;;  %s14_s9 = smov 3  ;;  %vm4_vm0 = vcmask 261120   ;;  %vm11_vm1 = vcmask 1048320   ;;  %vm18_vm2 = vcmask 785920   ;;  %vm25_vm3 = vcmask 523520   ;;  %s76_s0 = inlined_call_operand.vmem [shape: f32[8,32], index: 0, kind: input, shape index: {}]   ;;  %s77_s1 = inlined_call_operand.vmem [shape: f32[1,256], index: 1, kind: output, shape index: {}]  }
   0x1   :  { %v38_v0 = vld [vmem:[%s76_s0 + $0x3] ss:$4 sm:%s7_s6]   ;;  %s45_s10 = smov 96   ;;  %s21_s11 = smov 3  ;;  %v39_v1 = vld [vmem:[%s76_s0 + $0x2] ss:$4 sm:%s14_s9]  }
   0x2   :  { %9 = vrot.lane.b32.xlu0 %v38_v0, %s45_s10  ;;  %v40_v2 = vld [vmem:[%s76_s0 + $0x1] ss:$4 sm:%s21_s11]   ;;  %s2_s16 = smov 3  ;;  %s46_s17 = smov 32  }
   0x3   :  { %23 = vrot.lane.b32.xlu1 %v40_v2, %s46_s17  ;;  %v3_v3 = vld [vmem:[%s76_s0] ss:$4 sm:%s2_s16]   ;;  %s47_s0 = smov 64  }
   0x4   :  { %5 = vst.msk [vmem:[#allocation0] ss:$8 sm:$0x3] %vm4_vm0, %v3_v3  }
   0x6   :  { %16 = vrot.lane.b32.xlu0 %v39_v1, %s47_s0 }
  0x74   :  { %v10_v4 = vpop.permute.xlu0 %9  }
  0x75   :  { %12 = vst.msk [vmem:[#allocation0] ss:$8 sm:$0x3] %vm11_vm1, %v10_v4   ;;  %v24_v5 = vpop.permute.xlu1 %23  }
  0x78   :  { %v17_v6 = vpop.permute.xlu0 %16  }
  0x79   :  { %19 = vst.msk [vmem:[#allocation0] ss:$8 sm:$0x3] %vm18_vm2, %v17_v6  }
  0x7a   :  { %26 = vst.msk [vmem:[#allocation0] ss:$8 sm:$0x3] %vm25_vm3, %v24_v5  }
  0x81   :  { %v30_v7 = vld [vmem:[#allocation0] sm:$0x1]  ;;  %v34_v8 = vld [vmem:[#allocation0 + $0x8] sm:$0x1] }
  0x82   :  { %32 = vst [vmem:[%s77_s1] sm:$0x1] %v30_v7  ;;  %41 = vst [vmem:[%s77_s1 + $0x1] sm:$0x1] %v34_v8 }

// kernel: tile.18
= control target key start
LH: loop header
LB: loop body
LE: loop exit
PB: predicated region body
PF: predicated region fallthrough
CT: control target
= control target key end

     0   :  { %s22_s0 = inlined_call_operand.vmem [shape: f32[16], index: 0, kind: input, shape index: {}]   ;;  %s23_s1 = inlined_call_operand.vmem [shape: f32[8,16], index: 1, kind: output, shape index: {}]  }
   0x1   :  { %v4_v0 = vld [vmem:[%s22_s0] ss:$0 sm:$0xff] }
   0x2   :  { %5 = vst [vmem:[%s23_s1] sm:$0xff] %v4_v0 }

// kernel: tile.19
= control target key start
LH: loop header
LB: loop body
LE: loop exit
PB: predicated region body
PF: predicated region fallthrough
CT: control target
= control target key end

     0   :  { %s67_s10 = smov 112   ;;  %s68_s11 = smov 80   ;;  %vm3_vm0 = vcmask 130048   ;;  %vm9_vm1 = vcmask 1048448   ;;  %vm15_vm2 = vcmask 917248   ;;  %vm21_vm3 = vcmask 786048   ;;  %s111_s0 = inlined_call_operand.vmem [shape: f32[8,16], index: 0, kind: input, shape index: {}]   ;;  %s112_s1 = inlined_call_operand.vmem [shape: f32[1,128], index: 1, kind: output, shape index: {}]  }
   0x1   :  { %v53_v0 = vld [vmem:[%s111_s0 + $0x7] sm:$0x1]   ;;  %v55_v1 = vld [vmem:[%s111_s0 + $0x5] sm:$0x1]   ;;  %v54_v2 = vld [vmem:[%s111_s0 + $0x6] sm:$0x1]  }
   0x2   :  { %7 = vrot.lane.b32.xlu0 %v53_v0, %s67_s10  ;;  %19 = vrot.lane.b32.xlu1 %v55_v1, %s68_s11  ;;  %v56_v3 = vld [vmem:[%s111_s0 + $0x4] sm:$0x1]   ;;  %v2_v4 = vld [vmem:[%s111_s0] sm:$0x1]   ;;  %s69_s18 = smov 96   ;;  %s70_s19 = smov 64  }
   0x3   :  { %4 = vst.msk [vmem:[#allocation0] sm:$0x1] %vm3_vm0, %v2_v4   ;;  %v57_v5 = vld [vmem:[%s111_s0 + $0x3] sm:$0x1]   ;;  %v58_v6 = vld [vmem:[%s111_s0 + $0x2] sm:$0x1]  }
   0x4   :  { %s71_s24 = smov 48   ;;  %s72_s25 = smov 32   ;;  %v59_v7 = vld [vmem:[%s111_s0 + $0x1] sm:$0x1]   ;;  %vm27_vm4 = vcmask 654848   ;;  %vm33_vm5 = vcmask 523648  }
   0x5   :  { %s73_s0 = smov 16   ;;  %vm39_vm6 = vcmask 392448   ;;  %vm45_vm7 = vcmask 261248  }
   0x6   :  { %13 = vrot.lane.b32.xlu0 %v54_v2, %s69_s18  ;;  %25 = vrot.lane.b32.xlu1 %v56_v3, %s70_s19 }
   0xa   :  { %31 = vrot.lane.b32.xlu0 %v57_v5, %s71_s24  ;;  %37 = vrot.lane.b32.xlu1 %v58_v6, %s72_s25 }
   0xe   :  { %43 = vrot.lane.b32.xlu0 %v59_v7, %s73_s0 }
  0x74   :  { %v8_v8 = vpop.permute.xlu0 %7   ;;  %v20_v9 = vpop.permute.xlu1 %19  }
  0x75   :  { %10 = vst.msk [vmem:[#allocation0] sm:$0x1] %vm9_vm1, %v8_v8  }
  0x78   :  { %v14_v10 = vpop.permute.xlu0 %13   ;;  %v26_v11 = vpop.permute.xlu1 %25  }
  0x79   :  { %16 = vst.msk [vmem:[#allocation0] sm:$0x1] %vm15_vm2, %v14_v10  }
  0x7a   :  { %22 = vst.msk [vmem:[#allocation0] sm:$0x1] %vm21_vm3, %v20_v9  }
  0x7b   :  { %28 = vst.msk [vmem:[#allocation0] sm:$0x1] %vm27_vm4, %v26_v11  }
  0x7c   :  { %v32_v12 = vpop.permute.xlu0 %31   ;;  %v38_v13 = vpop.permute.xlu1 %37  }
  0x7d   :  { %34 = vst.msk [vmem:[#allocation0] sm:$0x1] %vm33_vm5, %v32_v12  }
  0x7e   :  { %40 = vst.msk [vmem:[#allocation0] sm:$0x1] %vm39_vm6, %v38_v13  }
  0x80   :  { %v44_v14 = vpop.permute.xlu0 %43  }
  0x81   :  { %46 = vst.msk [vmem:[#allocation0] sm:$0x1] %vm45_vm7, %v44_v14  }
  0x88   :  { %v50_v15 = vld [vmem:[#allocation0] sm:$0x1] }
  0x89   :  { %52 = vst [vmem:[%s112_s1] sm:$0x1] %v50_v15 }

// kernel: _mlp_as_gnn_impl.1
= control target key start
LH: loop header
LB: loop body
LE: loop exit
PB: predicated region body
PF: predicated region fallthrough
CT: control target
= control target key end

     0   :  { %v388_v7 = vmov 0.0   ;;  %s623_s0 = inlined_call_operand.vmem [shape: f32[2,128], index: 0, kind: input, shape index: {}]   ;;  %s624_s1 = inlined_call_operand.vmem [shape: f32[128,256], index: 1, kind: input, shape index: {}]   ;;  %s625_s2 = inlined_call_operand.vmem [shape: f32[1,256], index: 2, kind: input, shape index: {}]   ;;  %s626_s3 = inlined_call_operand.vmem [shape: f32[256,128], index: 3, kind: input, shape index: {}]   ;;  %s627_s4 = inlined_call_operand.vmem [shape: f32[1,128], index: 4, kind: input, shape index: {}]   ;;  %s628_s5 = inlined_call_operand.vmem [shape: f32[2,128], index: 5, kind: output, shape index: {}]  }
   0x1   :  { %v22_v0 = vld [vmem:[%s624_s1 + $0x8] sm:$0xff]  ;;  %v24_v1 = vld [vmem:[%s624_s1 + $0x18] sm:$0xff]  ;;  %v21_v2 = vld [vmem:[%s624_s1] sm:$0xff]  ;;  %161 = vmatprep.mubr.f32.mxu0 %v388_v7 }
   0x2   :  { %v323_v3 = vpack.c.bf16 %v24_v1, %v22_v0  ;;  %v23_v4 = vld [vmem:[%s624_s1 + $0x10] sm:$0xff]  ;;  %v26_v5 = vld [vmem:[%s624_s1 + $0x28] sm:$0xff]  ;;  %v28_v6 = vld [vmem:[%s624_s1 + $0x38] sm:$0xff] }
   0x3   :  { %v325_v8 = vpack.c.bf16 %v23_v4, %v21_v2  ;;  %v327_v9 = vpack.c.bf16 %v28_v6, %v26_v5  ;;  %v25_v10 = vld [vmem:[%s624_s1 + $0x20] sm:$0xff]  ;;  %v27_v11 = vld [vmem:[%s624_s1 + $0x30] sm:$0xff]  ;;  %v30_v12 = vld [vmem:[%s624_s1 + $0x48] sm:$0xff] }
   0x4   :  { %324 = vmatprep.subr.bf16.mxu0 %v323_v3  ;;  %v32_v13 = vld [vmem:[%s624_s1 + $0x58] sm:$0xff]  ;;  %v329_v14 = vpack.c.bf16 %v27_v11, %v25_v10  ;;  %v29_v16 = vld [vmem:[%s624_s1 + $0x40] sm:$0xff]  ;;  %v31_v17 = vld [vmem:[%s624_s1 + $0x50] sm:$0xff] }
   0x5   :  { %326 = vmatpush1.bf16.msra.mxu0 %v325_v8  ;;  %v331_v15 = vpack.c.bf16 %v32_v13, %v30_v12  ;;  %v34_v18 = vld [vmem:[%s624_s1 + $0x68] sm:$0xff]  ;;  %v36_v19 = vld [vmem:[%s624_s1 + $0x78] sm:$0xff]  ;;  %v333_v20 = vpack.c.bf16 %v31_v17, %v29_v16  ;;  %v33_v22 = vld [vmem:[%s624_s1 + $0x60] sm:$0xff] }
   0x6   :  { %328 = vmatprep.subr.bf16.mxu0 %v327_v9  ;;  %v335_v21 = vpack.c.bf16 %v36_v19, %v34_v18  ;;  %v35_v23 = vld [vmem:[%s624_s1 + $0x70] sm:$0xff]  ;;  %v38_v24 = vld [vmem:[%s624_s1 + $0x88] sm:$0xff]  ;;  %v40_v25 = vld [vmem:[%s624_s1 + $0x98] sm:$0xff] }
   0x7   :  { %v37_v26 = vld [vmem:[%s624_s1 + $0x80] sm:$0xff]  ;;  %v39_v27 = vld [vmem:[%s624_s1 + $0x90] sm:$0xff]  ;;  %v70_v29 = vld [vmem:[%s626_s3 + $0x88] sm:$0xff]  ;;  %v337_v31 = vpack.c.bf16 %v35_v23, %v33_v22  ;;  %v339_v36 = vpack.c.bf16 %v40_v25, %v38_v24 }
   0x8   :  { %v69_v28 = vld [vmem:[%s626_s3 + $0x80] sm:$0xff]  ;;  %v54_v33 = vld [vmem:[%s626_s3 + $0x8] sm:$0xff]  ;;  %v71_v34 = vld [vmem:[%s626_s3 + $0x90] sm:$0xff]  ;;  %v341_v46 = vpack.c.bf16 %v39_v27, %v37_v26 }
   0x9   :  { %330 = vmatpush1.bf16.msra.mxu0 %v329_v14  ;;  %v53_v30 = vld [vmem:[%s626_s3] sm:$0xff]  ;;  %v355_v32 = vpack.c.bf16 %v70_v29, %v69_v28  ;;  %v72_v35 = vld [vmem:[%s626_s3 + $0x98] sm:$0xff]  ;;  %v55_v39 = vld [vmem:[%s626_s3 + $0x10] sm:$0xff] }
   0xa   :  { %332 = vmatprep.subr.bf16.mxu0 %v331_v15  ;;  %v357_v37 = vpack.c.bf16 %v54_v33, %v53_v30  ;;  %v359_v38 = vpack.c.bf16 %v72_v35, %v71_v34  ;;  %v56_v40 = vld [vmem:[%s626_s3 + $0x18] sm:$0xff]  ;;  %v73_v41 = vld [vmem:[%s626_s3 + $0xa0] sm:$0xff]  ;;  %v42_v42 = vld [vmem:[%s624_s1 + $0xa8] sm:$0xff]  ;;  %v87_v34 = vlaneseq }
   0xb   :  { %v44_v43 = vld [vmem:[%s624_s1 + $0xb8] sm:$0xff]  ;;  %356 = vmatprep.subr.bf16.mxu1 %v355_v32  ;;  %v74_v44 = vld [vmem:[%s626_s3 + $0xa8] sm:$0xff]  ;;  %v361_v45 = vpack.c.bf16 %v56_v40, %v55_v39  ;;  %v41_v47 = vld [vmem:[%s624_s1 + $0xa0] sm:$0xff] }
   0xc   :  { %358 = vmatpush3.bf16.msra.mxu1 %v357_v37  ;;  %v363_v48 = vpack.c.bf16 %v74_v44, %v73_v41  ;;  %v57_v49 = vld [vmem:[%s626_s3 + $0x20] sm:$0xff]  ;;  %v58_v50 = vld [vmem:[%s626_s3 + $0x28] sm:$0xff]  ;;  %v343_v51 = vpack.c.bf16 %v44_v43, %v42_v42  ;;  %v43_v52 = vld [vmem:[%s624_s1 + $0xb0] sm:$0xff]  ;;  %v88_v35 = vshrl.u32 %v87_v34, 7 }
   0xd   :  { %334 = vmatpush1.bf16.msra.mxu0 %v333_v20  ;;  %360 = vmatprep.subr.bf16.mxu1 %v359_v38  ;;  %v75_v53 = vld [vmem:[%s626_s3 + $0xb0] sm:$0xff]  ;;  %v76_v54 = vld [vmem:[%s626_s3 + $0xb8] sm:$0xff]  ;;  %v46_v55 = vld [vmem:[%s624_s1 + $0xc8] sm:$0xff]  ;;  %v365_v57 = vpack.c.bf16 %v58_v50, %v57_v49  ;;  %v345_v58 = vpack.c.bf16 %v43_v52, %v41_v47 }
   0xe   :  { %336 = vmatprep.subr.bf16.mxu0 %v335_v21  ;;  %v48_v56 = vld [vmem:[%s624_s1 + $0xd8] sm:$0xff]  ;;  %v45_v59 = vld [vmem:[%s624_s1 + $0xc0] sm:$0xff]  ;;  %v367_v60 = vpack.c.bf16 %v76_v54, %v75_v53  ;;  %v59_v61 = vld [vmem:[%s626_s3 + $0x30] sm:$0xff]  ;;  %v93_v38 = vsub.s32 1, %v88_v35 }
   0xf   :  { %v60_v62 = vld [vmem:[%s626_s3 + $0x38] sm:$0xff]  ;;  %v347_v63 = vpack.c.bf16 %v48_v56, %v46_v55  ;;  %v47_v0 = vld [vmem:[%s624_s1 + $0xd0] sm:$0xff]  ;;  %v77_v1 = vld [vmem:[%s626_s3 + $0xc0] sm:$0xff] }
  0x10   :  { %362 = vmatpush3.bf16.msra.mxu1 %v361_v45  ;;  %v78_v2 = vld [vmem:[%s626_s3 + $0xc8] sm:$0xff]  ;;  %v52_v4 = vld [vmem:[%s624_s1 + $0xf8] sm:$0xff]  ;;  %v369_v5 = vpack.c.bf16 %v60_v62, %v59_v61  ;;  %v349_v6 = vpack.c.bf16 %v47_v0, %v45_v59  ;;  %v49_v7 = vld [vmem:[%s624_s1 + $0xe0] sm:$0xff] }
  0x11   :  { %338 = vmatpush1.bf16.msra.mxu0 %v337_v31  ;;  %364 = vmatprep.subr.bf16.mxu1 %v363_v48  ;;  %v50_v3 = vld [vmem:[%s624_s1 + $0xe8] sm:$0xff]  ;;  %v371_v8 = vpack.c.bf16 %v78_v2, %v77_v1  ;;  %v61_v9 = vld [vmem:[%s626_s3 + $0x40] sm:$0xff]  ;;  %v51_v12 = vld [vmem:[%s624_s1 + $0xf0] sm:$0xff] }
  0x12   :  { %340 = vmatprep.subr.bf16.mxu0 %v339_v36  ;;  %v62_v10 = vld [vmem:[%s626_s3 + $0x48] sm:$0xff]  ;;  %v351_v11 = vpack.c.bf16 %v52_v4, %v50_v3  ;;  %v79_v13 = vld [vmem:[%s626_s3 + $0xd0] sm:$0xff]  ;;  %v80_v14 = vld [vmem:[%s626_s3 + $0xd8] sm:$0xff]  ;;  %v353_v16 = vpack.c.bf16 %v51_v12, %v49_v7  ;;  %v89_v36 = vsub.s32 0, %v88_v35 }
  0x13   :  { %v373_v15 = vpack.c.bf16 %v62_v10, %v61_v9  ;;  %v375_v17 = vpack.c.bf16 %v80_v14, %v79_v13  ;;  %v63_v18 = vld [vmem:[%s626_s3 + $0x50] sm:$0xff]  ;;  %v64_v19 = vld [vmem:[%s626_s3 + $0x58] sm:$0xff]  ;;  %v81_v20 = vld [vmem:[%s626_s3 + $0xe0] sm:$0xff] }
  0x14   :  { %366 = vmatpush3.bf16.msra.mxu1 %v365_v57  ;;  %v82_v21 = vld [vmem:[%s626_s3 + $0xe8] sm:$0xff]  ;;  %v377_v22 = vpack.c.bf16 %v64_v19, %v63_v18  ;;  %v20_v23 = vld [vmem:[%s623_s0] sm:$0xff]  ;;  %v83_v28 = vld [vmem:[%s626_s3 + $0xf0] sm:$0xff] }
  0x15   :  { %342 = vmatpush1.bf16.msra.mxu0 %v341_v46  ;;  %368 = vmatprep.subr.bf16.mxu1 %v367_v60  ;;  %v379_v24 = vpack.c.bf16 %v82_v21, %v81_v20  ;;  %v65_v25 = vld [vmem:[%s626_s3 + $0x60] sm:$0xff]  ;;  %v66_v26 = vld [vmem:[%s626_s3 + $0x68] sm:$0xff]  ;;  %v84_v29 = vld [vmem:[%s626_s3 + $0xf8] sm:$0xff] }
  0x16   :  { %344 = vmatprep.subr.bf16.mxu0 %v343_v51  ;;  %v381_v27 = vpack.c.bf16 %v66_v26, %v65_v25  ;;  %v383_v30 = vpack.c.bf16 %v84_v29, %v83_v28  ;;  %v67_v31 = vld [vmem:[%s626_s3 + $0x70] sm:$0xff]  ;;  %v68_v32 = vld [vmem:[%s626_s3 + $0x78] sm:$0xff]  ;;  %v85_v37 = vld [vmem:[%s625_s2] sm:$0x3] }
  0x17   :  { %v385_v33 = vpack.c.bf16 %v68_v32, %v67_v31  ;;  %v90_v39 = vrot.slane %v85_v37, %v89_v36  ;;  %v94_v40 = vrot.slane %v85_v37, %v93_v38  ;;  %v287_v48 = vld [vmem:[%s627_s4] ss:$0 sm:$0xff] }
  0x18   :  { %370 = vmatpush3.bf16.msra.mxu1 %v369_v5 }
  0x19   :  { %346 = vmatpush1.bf16.msra.mxu0 %v345_v58  ;;  %372 = vmatprep.subr.bf16.mxu1 %v371_v8 }
  0x1a   :  { %348 = vmatprep.subr.bf16.mxu0 %v347_v63 }
  0x1c   :  { %374 = vmatpush3.bf16.msra.mxu1 %v373_v15 }
  0x1d   :  { %350 = vmatpush1.bf16.msra.mxu0 %v349_v6  ;;  %376 = vmatprep.subr.bf16.mxu1 %v375_v17 }
  0x1e   :  { %352 = vmatprep.subr.bf16.mxu0 %v351_v11 }
  0x20   :  { %378 = vmatpush3.bf16.msra.mxu1 %v377_v22 }
  0x21   :  { %354 = vmatpush1.bf16.msra.mxu0 %v353_v16  ;;  %380 = vmatprep.subr.bf16.mxu1 %v379_v24 }
  0x24   :  { %162 = vmatmul.mubr.f32.vlgmr.msra.gmra.mrb[0].mxu0 %v20_v23  ;;  %382 = vmatpush3.bf16.msra.mxu1 %v381_v27 }
  0x25   :  { %384 = vmatprep.subr.bf16.mxu1 %v383_v30 }
  0x28   :  { %386 = vmatpush3.bf16.msra.mxu1 %v385_v33 }
  0xf7   :  { %v163_v41 = vpop.f32.mrb[0].mxu0 }
  0xf8   :  { %v164_v42 = vadd.f32 %v163_v41, %v90_v39  ;;  %v165_v43 = vpop.f32.mrb[1].mxu0 }
  0xf9   :  { %v166_v44 = vadd.f32 %v165_v43, %v94_v40 }
  0xfa   :  { %v168_v46 = vmax.f32 %v164_v42, 0.0 }
  0xfb   :  { %v169_v45 = vmax.f32 %v166_v44, 0.0 }
  0xfd   :  { %241 = vmatprep.mubr.f32.mxu1 %v169_v45 }
  0xfe   :  { %242 = vmatmul.mubr.f32.vlgmr.msra.gmra.mrb[0].mxu1 %v168_v46 }
 0x1d1   :  { %v320_v47 = vpop.f32.mrb[0].mxu1 }
 0x1d2   :  { %v321_v49 = vpop.f32.mrb[1].mxu1 }
 0x1d3   :  { %v322_v50 = vadd.f32 %v321_v49, %v320_v47 }
 0x1d5   :  { %v244_v51 = vadd.f32 %v322_v50, %v287_v48 }
 0x1d7   :  { %247 = vst [vmem:[#allocation2] sm:$0xff] %v244_v51 }
 0x1de   :  { %v265_v52 = vld [vmem:[#allocation2] sm:$0x3] }
 0x1df   :  { %266 = vst [vmem:[%s628_s5] sm:$0x3] %v265_v52 }

</bundles_post_ra>
